<compile_context>
chip_gen: v7x
topology: tpu7x:2x2x1
jax: 0.10.0
libtpu: 0.0.40
codegen_flags: <defaults>
</compile_context>

<pallas_src>
import functools

import jax
import jax.numpy as jnp
from jax.experimental import pallas as pl
from jax.experimental.pallas import tpu as pltpu

BN_EPS = 1e-5
LANE = 128


def _round_up(x, m):
    return (x + m - 1) // m * m


def _tpu_vmem_bytes(default=64 << 20):
    # Trace-time hardware query; fall back to the most conservative (v7x) size.
    try:
        info = pltpu.get_tpu_info()
        return int(getattr(info, "vmem_capacity_bytes", default))
    except Exception:
        return default


# ---------------- Pass 1: GEMM tile -> BatchNorm partial sums only ----------------
def conv_stats_kernel(p_ref, w_ref, stats_ref):
    # p_ref: (TM, K) bf16 patch tile; w_ref: (K, Cp) bf16 resident weights.
    y = jnp.dot(p_ref[...], w_ref[...], preferred_element_type=jnp.float32)
    ssum = jnp.sum(y, axis=0, keepdims=True)       # (1, Cp)
    ssq = jnp.sum(y * y, axis=0, keepdims=True)    # (1, Cp)
    stats_ref[...] = jnp.concatenate([ssum, ssq], axis=0)   # single (2, Cp) store


# ---- Pass 2: GEMM tile -> folded BN affine -> ReLU -> channels-major store ----
def conv_bn_relu_kernel(p_ref, w_ref, scale_ref, shift_ref, o_ref):
    y = jnp.dot(p_ref[...], w_ref[...], preferred_element_type=jnp.float32)
    y = jnp.maximum(y * scale_ref[...] + shift_ref[...], 0.0)   # (TM, Cp)
    yt = jnp.transpose(y)                                       # (Cp, TM) via XLU
    # Store only the sublane-padded channels; output tile is channels-major,
    # i.e. already NCHW-flat (no 128-lane padding on the stores).
    o_ref[...] = yt[: o_ref.shape[0], :].astype(o_ref.dtype)


def _build_patches(x_nchw, kh, kw, stride, pad, hwp):
    """bf16 im2col built directly at the padded (N, HWp, K) shape."""
    N, C, H, W = x_nchw.shape
    # TODO(synk): implicit GEMM would stream NCHW directly and remove both this
    # transpose and the KH*KW x patch materialization.
    x = jnp.transpose(x_nchw, (0, 2, 3, 1)).astype(jnp.bfloat16)   # cast BEFORE im2col
    xp = jnp.pad(x, ((0, 0), (pad, pad), (pad, pad), (0, 0)))
    Ho = (H + 2 * pad - kh) // stride + 1
    Wo = (W + 2 * pad - kw) // stride + 1
    cols = []
    for i in range(kh):
        for j in range(kw):
            cols.append(xp[:, i:i + Ho * stride:stride, j:j + Wo * stride:stride, :])
    p = jnp.stack(cols, axis=3).reshape(N, Ho * Wo, kh * kw * C)
    if hwp > Ho * Wo:
        p = jnp.pad(p, ((0, 0), (0, hwp - Ho * Wo), (0, 0)))       # pad folded in
    return p


@functools.partial(jax.jit, static_argnames=("stride", "padding"))
def cnn_block_forward(x_nchw, conv_w, gamma, beta, *, stride=1, padding=1):
    """x_nchw: (N, Cin, H, W); conv_w: (Cout, Cin, KH, KW) (PyTorch layout)."""
    N, Cin, H, W = x_nchw.shape
    Cout, _, KH, KW = conv_w.shape
    Ho = (H + 2 * padding - KH) // stride + 1
    Wo = (W + 2 * padding - KW) // stride + 1
    HW = Ho * Wo
    K = KH * KW * Cin
    M = N * HW

    Cp = _round_up(Cout, LANE)     # MXU / lane width of the matmul N dimension
    Cp8 = _round_up(Cout, 8)       # sublane-padded channels actually stored

    # ---- tile size solved from the actual per-tile VMEM byte budget ----------
    vmem_phys = _tpu_vmem_bytes()
    budget = int(vmem_phys * 0.55)                 # headroom for compiler scratch
    # per unit of TM: dbl-buffered bf16 patches, dbl-buffered f32 out tile,
    # plus the in-kernel f32 y / y^T temporaries.
    bytes_per_tm = 4 * K + 8 * Cp8 + 12 * Cp
    fixed = 2 * (K * Cp * 2) + 4 * (Cp * 4) + 2 * (2 * Cp * 4)   # weights, scale/shift, stats
    tm_cap = 4096 if vmem_phys >= (100 << 20) else 2048          # bigger tiles on 128 MiB parts
    tm_fit = max(LANE, (budget - fixed - (4 << 20)) // max(bytes_per_tm, 1))
    TM = min(tm_fit, tm_cap, _round_up(HW, LANE))
    TM = max(LANE, (TM // LANE) * LANE)            # TM is the lane dim of the output tile
    HWp = _round_up(HW, TM)
    n_hw_tiles = HWp // TM

    need = bytes_per_tm * TM + fixed
    vmem_limit = int(min(max(int(need * 1.5), 32 << 20), int(vmem_phys * 0.6)))

    # ---- operands -------------------------------------------------------------
    patches = _build_patches(x_nchw, KH, KW, stride, padding, HWp)   # (N, HWp, K) bf16
    w_mat = jnp.transpose(conv_w, (2, 3, 1, 0)).reshape(K, Cout)     # K ordered (kh, kw, Cin)
    w_p = jnp.zeros((K, Cp), jnp.bfloat16).at[:, :Cout].set(w_mat.astype(jnp.bfloat16))

    # ---- Pass 1: stats only ---------------------------------------------------
    stats = pl.pallas_call(
        conv_stats_kernel,
        grid=(N, n_hw_tiles),
        out_shape=jax.ShapeDtypeStruct((N, n_hw_tiles, 2, Cp), jnp.float32),
        in_specs=[
            pl.BlockSpec((None, TM, K), lambda n, t: (n, t, 0)),   # streamed patches
            pl.BlockSpec((K, Cp), lambda n, t: (0, 0)),            # resident weights
        ],
        out_specs=pl.BlockSpec((None, None, 2, Cp), lambda n, t: (n, t, 0, 0)),
        compiler_params=pltpu.CompilerParams(
            dimension_semantics=("parallel", "parallel"),
            vmem_limit_bytes=vmem_limit,
        ),
        cost_estimate=pl.CostEstimate(
            flops=2 * N * HWp * K * Cp,
            transcendentals=0,
            bytes_accessed=N * HWp * K * 2 + K * Cp * 2 + N * n_hw_tiles * 2 * Cp * 4,
        ),
    )(patches, w_p)

    # ---- combine partials -> train-mode BatchNorm2d statistics ----------------
    # Padded rows / channels are exactly zero, so they add nothing to the sums.
    ssum = jnp.sum(stats[:, :, 0, :], axis=(0, 1))     # (Cp,)
    ssq = jnp.sum(stats[:, :, 1, :], axis=(0, 1))      # (Cp,)
    mean = ssum / M
    var = jnp.maximum(ssq / M - mean * mean, 0.0)      # biased batch variance
    # TODO(synk): Welford-style (per-tile centered) partials would avoid the
    # E[y^2]-E[y]^2 cancellation for extremely large batches.
    inv_std = jax.lax.rsqrt(var + BN_EPS)
    gamma_p = jnp.zeros((Cp,), jnp.float32).at[:Cout].set(gamma.astype(jnp.float32))
    beta_p = jnp.zeros((Cp,), jnp.float32).at[:Cout].set(beta.astype(jnp.float32))
    scale = (gamma_p * inv_std).reshape(1, Cp)                    # folded BN affine
    shift = (beta_p - mean * gamma_p * inv_std).reshape(1, Cp)
    # TODO(synk): running_mean / running_var (momentum) buffer updates of
    # nn.BatchNorm2d are not part of this pure forward pass.

    # ---- Pass 2: fused GEMM + BN + ReLU, channels-major (NCHW-flat) output ----
    out_cm = pl.pallas_call(
        conv_bn_relu_kernel,
        grid=(N, n_hw_tiles),
        out_shape=jax.ShapeDtypeStruct((N, Cp8, HWp), jnp.float32),
        in_specs=[
            pl.BlockSpec((None, TM, K), lambda n, t: (n, t, 0)),   # streamed patches
            pl.BlockSpec((K, Cp), lambda n, t: (0, 0)),            # resident weights
            pl.BlockSpec((1, Cp), lambda n, t: (0, 0)),            # resident scale
            pl.BlockSpec((1, Cp), lambda n, t: (0, 0)),            # resident shift
        ],
        out_specs=pl.BlockSpec((None, Cp8, TM), lambda n, t: (n, 0, t)),
        compiler_params=pltpu.CompilerParams(
            dimension_semantics=("parallel", "parallel"),
            vmem_limit_bytes=vmem_limit,
        ),
        cost_estimate=pl.CostEstimate(
            flops=2 * N * HWp * K * Cp + 2 * N * HWp * Cp,
            transcendentals=0,
            bytes_accessed=N * HWp * K * 2 + K * Cp * 2 + 2 * Cp * 4
            + N * Cp8 * HWp * 4,
        ),
    )(patches, w_p, scale, shift)

    # Output is already NCHW-flat; only slice off sublane/HW padding.
    return out_cm[:, :Cout, :HW].reshape(N, Cout, Ho, Wo)


def _reference(x_nchw, conv_w, gamma, beta, *, stride=1, padding=1):
    # Pure-JAX f32 reference matching CNNBlock.forward (train-mode BN).
    y = jax.lax.conv_general_dilated(
        x_nchw, conv_w, window_strides=(stride, stride),
        padding=[(padding, padding), (padding, padding)],
        dimension_numbers=("NCHW", "OIHW", "NCHW"),
    )
    mean = jnp.mean(y, axis=(0, 2, 3), keepdims=True)
    var = jnp.mean((y - mean) ** 2, axis=(0, 2, 3), keepdims=True)
    y_hat = (y - mean) * jax.lax.rsqrt(var + BN_EPS)
    out = y_hat * gamma.reshape(1, -1, 1, 1) + beta.reshape(1, -1, 1, 1)
    return jnp.maximum(out, 0.0)


if __name__ == "__main__":
    # CNNBlock(in_channels=4, out_channels=8, kernel_size=3, stride=1, padding=1)
    N, Cin, H, W = 2, 4, 16, 16
    Cout, KH, KW = 8, 3, 3

    key = jax.random.PRNGKey(0)
    kx, kw = jax.random.split(key)
    x = jax.random.normal(kx, (N, Cin, H, W), dtype=jnp.float32)
    conv_w = jax.random.normal(kw, (Cout, Cin, KH, KW), dtype=jnp.float32) * 0.1
    # BatchNorm2d default init: weight (gamma) = 1, bias (beta) = 0
    gamma = jnp.ones((Cout,), dtype=jnp.float32)
    beta = jnp.zeros((Cout,), dtype=jnp.float32)

    out = cnn_block_forward(x, conv_w, gamma, beta, stride=1, padding=1)
    out = jax.block_until_ready(out)

    ref = _reference(x, conv_w, gamma, beta, stride=1, padding=1)
    assert out.shape == (N, Cout, H, W)
    # bf16 matmul operands (f32 accumulation) -> compare with a bf16-level tolerance.
    assert jnp.max(jnp.abs(out - ref)) < 5e-2

    print("KERNEL_OK")
</pallas_src>

<mosaic_0001>
module attributes {stable_mosaic.version = 11 : i64} {
  func.func @conv_stats_kernel(%arg0: i32, %arg1: i32, %arg2: memref<1x256x36xbf16, #tpu.memory_space<vmem>>, %arg3: memref<36x128xbf16, #tpu.memory_space<vmem>>, %arg4: memref<1x1x2x128xf32, #tpu.memory_space<vmem>>) attributes {dimension_semantics = [#tpu.dimension_semantics<parallel>, #tpu.dimension_semantics<parallel>], iteration_bounds = array<i64: 2, 1>, scalar_prefetch = 0 : i64, scratch_operands = 0 : i64, tpu.core_type = #tpu.core_type<tc>, window_params = [{transform_indices = @transform_0, window_bounds = array<i64: 1, 256, 36>}, {pipeline_mode = #tpu.pipeline_mode<synchronous>, transform_indices = @transform_1, window_bounds = array<i64: 36, 128>}, {transform_indices = @transform_2, window_bounds = array<i64: 1, 1, 2, 128>}]} {
    %c0 = arith.constant 0 : index
    %c0_0 = arith.constant 0 : index
    %c0_1 = arith.constant 0 : index
    %0 = vector.load %arg2[%c0, %c0_0, %c0_1] : memref<1x256x36xbf16, #tpu.memory_space<vmem>>, vector<1x256x36xbf16>
    %1 = vector.shape_cast %0 : vector<1x256x36xbf16> to vector<256x36xbf16>
    %c0_2 = arith.constant 0 : index
    %c0_3 = arith.constant 0 : index
    %2 = vector.load %arg3[%c0_2, %c0_3] : memref<36x128xbf16, #tpu.memory_space<vmem>>, vector<36x128xbf16>
    %cst = arith.constant dense<0.000000e+00> : vector<256x128xf32>
    %3 = tpu.matmul %1, %2, %cst {dimension_numbers = #tpu.dot_dimension_numbers<[1], [0], [0], [1], [0, 0, 1, 1], [], []>} : vector<256x36xbf16>, vector<36x128xbf16>, vector<256x128xf32> -> vector<256x128xf32>
    %cst_4 = arith.constant dense<0.000000e+00> : vector<128xf32>
    %4 = vector.multi_reduction <add>, %3, %cst_4 [0] : vector<256x128xf32> to vector<128xf32>
    %5 = vector.shape_cast %4 : vector<128xf32> to vector<1x128xf32>
    %6 = arith.mulf %3, %3 : vector<256x128xf32>
    %cst_5 = arith.constant dense<0.000000e+00> : vector<128xf32>
    %7 = vector.multi_reduction <add>, %6, %cst_5 [0] : vector<256x128xf32> to vector<128xf32>
    %8 = vector.shape_cast %7 : vector<128xf32> to vector<1x128xf32>
    %9 = tpu.concatenate %5, %8 in 0 : vector<1x128xf32>, vector<1x128xf32> -> vector<2x128xf32>
    %c0_6 = arith.constant 0 : index
    %c0_7 = arith.constant 0 : index
    %c0_8 = arith.constant 0 : index
    %c0_9 = arith.constant 0 : index
    %10 = vector.load %arg4[%c0_6, %c0_7, %c0_8, %c0_9] : memref<1x1x2x128xf32, #tpu.memory_space<vmem>>, vector<1x1x2x128xf32>
    %11 = vector.shape_cast %10 : vector<1x1x2x128xf32> to vector<2x128xf32>
    %12 = vector.shape_cast %9 : vector<2x128xf32> to vector<1x1x2x128xf32>
    tpu.vector_store %arg4[%c0_6, %c0_7, %c0_8, %c0_9], %12 {strides = array<i32>} : memref<1x1x2x128xf32, #tpu.memory_space<vmem>>, vector<1x1x2x128xf32>,
    return
  }
  func.func @transform_0(%arg0: i32, %arg1: i32) -> (i32, i32, i32) {
    %c0_i32 = arith.constant 0 : i32
    %c0_i32_0 = arith.constant 0 : i32
    return %arg0, %arg1, %c0_i32 : i32, i32, i32
  }
  func.func @transform_1(%arg0: i32, %arg1: i32) -> (i32, i32) {
    %c0_i32 = arith.constant 0 : i32
    %c0_i32_0 = arith.constant 0 : i32
    %c0_i32_1 = arith.constant 0 : i32
    return %c0_i32, %c0_i32_0 : i32, i32
  }
  func.func @transform_2(%arg0: i32, %arg1: i32) -> (i32, i32, i32, i32) {
    %c0_i32 = arith.constant 0 : i32
    %c0_i32_0 = arith.constant 0 : i32
    %c0_i32_1 = arith.constant 0 : i32
    return %arg0, %arg1, %c0_i32, %c0_i32_0 : i32, i32, i32, i32
  }
}

module attributes {stable_mosaic.version = 11 : i64} {
  func.func @conv_bn_relu_kernel(%arg0: i32, %arg1: i32, %arg2: memref<1x256x36xbf16, #tpu.memory_space<vmem>>, %arg3: memref<36x128xbf16, #tpu.memory_space<vmem>>, %arg4: memref<1x128xf32, #tpu.memory_space<vmem>>, %arg5: memref<1x128xf32, #tpu.memory_space<vmem>>, %arg6: memref<1x8x256xf32, #tpu.memory_space<vmem>>) attributes {dimension_semantics = [#tpu.dimension_semantics<parallel>, #tpu.dimension_semantics<parallel>], iteration_bounds = array<i64: 2, 1>, scalar_prefetch = 0 : i64, scratch_operands = 0 : i64, tpu.core_type = #tpu.core_type<tc>, window_params = [{transform_indices = @transform_0, window_bounds = array<i64: 1, 256, 36>}, {pipeline_mode = #tpu.pipeline_mode<synchronous>, transform_indices = @transform_1, window_bounds = array<i64: 36, 128>}, {pipeline_mode = #tpu.pipeline_mode<synchronous>, transform_indices = @transform_2, window_bounds = array<i64: 1, 128>}, {pipeline_mode = #tpu.pipeline_mode<synchronous>, transform_indices = @transform_3, window_bounds = array<i64: 1, 128>}, {transform_indices = @transform_4, window_bounds = array<i64: 1, 8, 256>}]} {
    %c0 = arith.constant 0 : index
    %c0_0 = arith.constant 0 : index
    %c0_1 = arith.constant 0 : index
    %0 = vector.load %arg2[%c0, %c0_0, %c0_1] : memref<1x256x36xbf16, #tpu.memory_space<vmem>>, vector<1x256x36xbf16>
    %1 = vector.shape_cast %0 : vector<1x256x36xbf16> to vector<256x36xbf16>
    %c0_2 = arith.constant 0 : index
    %c0_3 = arith.constant 0 : index
    %2 = vector.load %arg3[%c0_2, %c0_3] : memref<36x128xbf16, #tpu.memory_space<vmem>>, vector<36x128xbf16>
    %cst = arith.constant dense<0.000000e+00> : vector<256x128xf32>
    %3 = tpu.matmul %1, %2, %cst {dimension_numbers = #tpu.dot_dimension_numbers<[1], [0], [0], [1], [0, 0, 1, 1], [], []>} : vector<256x36xbf16>, vector<36x128xbf16>, vector<256x128xf32> -> vector<256x128xf32>
    %c0_4 = arith.constant 0 : index
    %c0_5 = arith.constant 0 : index
    %4 = vector.load %arg4[%c0_4, %c0_5] : memref<1x128xf32, #tpu.memory_space<vmem>>, vector<1x128xf32>
    %5 = vector.broadcast %4 : vector<1x128xf32> to vector<256x128xf32>
    %6 = arith.mulf %3, %5 : vector<256x128xf32>
    %c0_6 = arith.constant 0 : index
    %c0_7 = arith.constant 0 : index
    %7 = vector.load %arg5[%c0_6, %c0_7] : memref<1x128xf32, #tpu.memory_space<vmem>>, vector<1x128xf32>
    %8 = vector.broadcast %7 : vector<1x128xf32> to vector<256x128xf32>
    %9 = arith.addf %6, %8 : vector<256x128xf32>
    %cst_8 = arith.constant 0.000000e+00 : f32
    %10 = vector.broadcast %cst_8 : f32 to vector<256x128xf32>
    %11 = arith.maximumf %9, %10 : vector<256x128xf32>
    %12 = tpu.transpose %11, [1, 0] : vector<256x128xf32> -> vector<128x256xf32>
    %13 = vector.extract_strided_slice %12 {offsets = [0, 0], sizes = [8, 256], strides = [1, 1]} : vector<128x256xf32> to vector<8x256xf32>
    %c0_9 = arith.constant 0 : index
    %c0_10 = arith.constant 0 : index
    %c0_11 = arith.constant 0 : index
    %14 = vector.load %arg6[%c0_9, %c0_10, %c0_11] : memref<1x8x256xf32, #tpu.memory_space<vmem>>, vector<1x8x256xf32>
    %15 = vector.shape_cast %14 : vector<1x8x256xf32> to vector<8x256xf32>
    %16 = vector.shape_cast %13 : vector<8x256xf32> to vector<1x8x256xf32>
    tpu.vector_store %arg6[%c0_9, %c0_10, %c0_11], %16 {strides = array<i32>} : memref<1x8x256xf32, #tpu.memory_space<vmem>>, vector<1x8x256xf32>,
    return
  }
  func.func @transform_0(%arg0: i32, %arg1: i32) -> (i32, i32, i32) {
    %c0_i32 = arith.constant 0 : i32
    %c0_i32_0 = arith.constant 0 : i32
    return %arg0, %arg1, %c0_i32 : i32, i32, i32
  }
  func.func @transform_1(%arg0: i32, %arg1: i32) -> (i32, i32) {
    %c0_i32 = arith.constant 0 : i32
    %c0_i32_0 = arith.constant 0 : i32
    %c0_i32_1 = arith.constant 0 : i32
    return %c0_i32, %c0_i32_0 : i32, i32
  }
  func.func @transform_2(%arg0: i32, %arg1: i32) -> (i32, i32) {
    %c0_i32 = arith.constant 0 : i32
    %c0_i32_0 = arith.constant 0 : i32
    %c0_i32_1 = arith.constant 0 : i32
    return %c0_i32, %c0_i32_0 : i32, i32
  }
  func.func @transform_3(%arg0: i32, %arg1: i32) -> (i32, i32) {
    %c0_i32 = arith.constant 0 : i32
    %c0_i32_0 = arith.constant 0 : i32
    %c0_i32_1 = arith.constant 0 : i32
    return %c0_i32, %c0_i32_0 : i32, i32
  }
  func.func @transform_4(%arg0: i32, %arg1: i32) -> (i32, i32, i32) {
    %c0_i32 = arith.constant 0 : i32
    %c0_i32_0 = arith.constant 0 : i32
    return %arg0, %c0_i32, %arg1 : i32, i32, i32
  }
}

</mosaic_0001>

<bundles_post_ra>
// kernel: cnn_block_forward.2
= control target key start
LH: loop header
LB: loop body
LE: loop exit
PB: predicated region body
PF: predicated region fallthrough
CT: control target
= control target key end

     0   :  { %s904_s9 = smov 0   ;;  %s906_s10 = smov 0   ;;  %s1014_s0 = inlined_call_operand.vmem [shape: bf16[2,256,36], index: 0, kind: input, shape index: {}]   ;;  %s1015_s1 = inlined_call_operand.vmem [shape: bf16[36,128], index: 1, kind: input, shape index: {}]   ;;  %s1016_s2 = inlined_call_operand.vmem [shape: f32[2,1,2,128], index: 2, kind: output, shape index: {}]  }
   0x1   :  { %s908_s11 = smov 0  }
   0x2 LB: > { %s24_s12 = sadd.s32 1, %s883_s10  ;;  %p715_p0 = scmp.ge.s32.totalorder %s887_s11, 1  ;;  %s887_s11 = sphi %s908_s11, %s12_s11   ;;  %s883_s10 = sphi %s906_s10, %s1018_s10   ;;  %s879_s9 = sphi %s904_s9, %s1017_s9  }
   0x3   : > { %p26_p1 = scmp.ge.s32.totalorder %s24_s12, 2  ;;  %p133_p2 = scmp.lt.s32.totalorder %s887_s11, 3 }
   0x5   : > { %s1020_s12 = smov (%p26_p1, %s24_s12), 0  ;;  %p134_p3 = pnand %p715_p0, %p133_p2 }
   0x6   : > { %v846_v0 = vld [vmem:[%s1015_s1] sm:$0xff] (!%p134_p3)   ;;  %v847_v1 = vld [vmem:[%s1015_s1 + $0x8] sm:$0xff] (!%p134_p3)   ;;  %p162_p4 = scmp.lt.s32.totalorder (!%p134_p3), %s879_s9, 1  ;;  %v848_v2 = vld [vmem:[%s1015_s1 + $0x10] ss:$0 sps:$4 sm:$0x33] (!%p134_p3)  }
   0x7   : > { %137 = sbr.rel (%p134_p3) target bundleno = 312 (0x138), region = 28  ;;  %776 = vmatprep.subr.bf16.mxu0 (!%p134_p3), %v846_v0  ;;  %814 = vmatprep.subr.bf16.mxu1 (!%p134_p3), %v846_v0  ;;  %vm360_vm0 = vcmask (!%p134_p3), 1041408   ;;  %vm311_vm1 = vcmask (!%p134_p3), 293888   ;;  %vm631_vm2 = vcmask (!%p134_p3), 1040384  }
   0x8   : > { %777 = vmatpush3.bf16.msra.mxu0 (!%p134_p3), %v846_v0  ;;  %817 = vmatpush3.bf16.msra.mxu1 (!%p134_p3), %v846_v0  ;;  %v362_v4 = vsel (!%p134_p3), %vm360_vm0, %v848_v2, 0 }
   0x9   : > { %778 = vmatprep.subr.bf16.mxu0 (!%p134_p3), %v847_v1  ;;  %815 = vmatprep.subr.bf16.mxu1 (!%p134_p3), %v847_v1 }
   0xc   : > { %779 = vmatpush3.bf16.msra.mxu0 (!%p134_p3), %v847_v1  ;;  %818 = vmatpush3.bf16.msra.mxu1 (!%p134_p3), %v847_v1 }
   0xd   : > { %820 = vmatprep.subr.msk.bf16.mxu0 (!%p134_p3), %vm360_vm0, %v848_v2  ;;  %821 = vmatprep.subr.msk.bf16.mxu1 (!%p134_p3), %vm360_vm0, %v848_v2 }
   0xe   : > { %s1022_s9 = smov (!%p162_p4, %s879_s9), 1 }
   0xf   : > { %s756_s19 = sshll.u32 %s1022_s9, 7  ;;  %s718_s23 = sshll.u32 %s1022_s9, 1 }
  0x10   : > { %s937_s22 = scalar_lea.vmem %s1014_s0, %s756_s19  ;;  %781 = vmatpush3.bf16.msra.mxu0 %v362_v4  ;;  %819 = vmatpush3.bf16.msra.mxu1 %v362_v4  ;;  %s177_s26 = scalar_lea.vmem %s1016_s2, %s718_s23 }
  0x11   : > { %v849_v3 = vld [vmem:[%s937_s22] sm:$0xff]   ;;  %v850_v5 = vld [vmem:[%s937_s22 + $0x8] sm:$0xff]   ;;  %v851_v6 = vld [vmem:[%s937_s22 + $0x10] sm:$0xff]  }
  0x12   : > { %782 = vmatprep.mubr.msk.bf16.mxu0 %vm311_vm1, %v849_v3  ;;  %v857_v7 = vld [vmem:[%s937_s22 + $0x40] sm:$0xff]   ;;  %v858_v8 = vld [vmem:[%s937_s22 + $0x48] sm:$0xff]   ;;  %v859_v9 = vld [vmem:[%s937_s22 + $0x50] sm:$0xff]  }
  0x13   : > { %783 = vmatmul.mubr.msk.bf16.vlgmr.msra.gmra.mrb[0].mxu0 %vm311_vm1, %v850_v5  ;;  %798 = vmatprep.mubr.msk.bf16.mxu1 %vm311_vm1, %v857_v7  ;;  %v852_v10 = vld [vmem:[%s937_s22 + $0x18] sm:$0xff]   ;;  %v853_v11 = vld [vmem:[%s937_s22 + $0x20] sm:$0xff]   ;;  %v854_v14 = vld [vmem:[%s937_s22 + $0x28] sm:$0xff]  }
  0x14   : > { %786 = vmatprep.mubr.msk.bf16.mxu0 %vm311_vm1, %v851_v6  ;;  %799 = vmatmul.mubr.msk.bf16.vlgmr.msra.gmra.mrb[0].mxu1 %vm311_vm1, %v858_v8  ;;  %v860_v12 = vld [vmem:[%s937_s22 + $0x58] sm:$0xff]   ;;  %v861_v13 = vld [vmem:[%s937_s22 + $0x60] sm:$0xff]   ;;  %v855_v15 = vld [vmem:[%s937_s22 + $0x30] sm:$0xff]  }
  0x15   : > { %802 = vmatprep.mubr.msk.bf16.mxu1 %vm311_vm1, %v859_v9  ;;  %v862_v16 = vld [vmem:[%s937_s22 + $0x68] sm:$0xff]   ;;  %v863_v17 = vld [vmem:[%s937_s22 + $0x70] sm:$0xff]   ;;  %v856_v18 = vld [vmem:[%s937_s22 + $0x38] sm:$0xff]  }
  0x16   : > { %v864_v19 = vld [vmem:[%s937_s22 + $0x78] sm:$0xff]  }
  0x1b   : > { %787 = vmatmul.mubr.msk.bf16.gmra.mrb[4].mxu0 %vm311_vm1, %v852_v10 }
  0x1c   : > { %790 = vmatprep.mubr.msk.bf16.mxu0 %vm311_vm1, %v853_v11  ;;  %803 = vmatmul.mubr.msk.bf16.gmra.mrb[4].mxu1 %vm311_vm1, %v860_v12 }
  0x1d   : > { %806 = vmatprep.mubr.msk.bf16.mxu1 %vm311_vm1, %v861_v13 }
  0x23   : > { %791 = vmatmul.mubr.msk.bf16.gmra.mrb[8].mxu0 %vm311_vm1, %v854_v14 }
  0x24   : > { %794 = vmatprep.mubr.msk.bf16.mxu0 %vm311_vm1, %v855_v15  ;;  %807 = vmatmul.mubr.msk.bf16.gmra.mrb[8].mxu1 %vm311_vm1, %v862_v16 }
  0x25   : > { %810 = vmatprep.mubr.msk.bf16.mxu1 %vm311_vm1, %v863_v17 }
  0x2b   : > { %795 = vmatmul.mubr.msk.bf16.gmra.mrb[12].mxu0 %vm311_vm1, %v856_v18 }
  0x2c   : > { %811 = vmatmul.mubr.msk.bf16.gmra.mrb[12].mxu1 %vm311_vm1, %v864_v19 }
  0xe6   : > { %v784_v20 = vpop.f32.mrb[0].mxu0 }
  0xe7   : > { %v398_v21 = vpop.f32.mrb[1].mxu0  ;;  %v971_v27 = vpop.f32.mrb[0].mxu1  ;;  %v564_v29 = vmul.f32 %v784_v20, %v784_v20 }
  0xe8   : > { %v785_v22 = vpop.f32.mrb[2].mxu0  ;;  %v562_v24 = vmul.f32 %v398_v21, %v398_v21  ;;  %v973_v28 = vpop.f32.mrb[1].mxu1 }
  0xe9   : > { %v401_v23 = vpop.f32.mrb[3].mxu0  ;;  %v975_v32 = vpop.f32.mrb[2].mxu1  ;;  %v565_v34 = vmul.f32 %v785_v22, %v785_v22 }
  0xea   : > { %v525_v25 = vadd.f32 %v401_v23, %v398_v21  ;;  %v563_v26 = vmul.f32 %v401_v23, %v401_v23  ;;  %v977_v33 = vpop.f32.mrb[3].mxu1 }
  0xec   : > { %v526_v30 = vadd.f32 %v784_v20, %v525_v25  ;;  %v594_v31 = vadd.f32 %v563_v26, %v562_v24 }
  0xee   : > { %v595_v35 = vadd.f32 %v594_v31, %v564_v29  ;;  %v788_v36 = vpop.f32.mrb[4].mxu0  ;;  %v527_v37 = vadd.f32 %v785_v22, %v526_v30 }
  0xef   : > { %v414_v38 = vpop.f32.mrb[5].mxu0  ;;  %v979_v47 = vpop.f32.mrb[4].mxu1  ;;  %v568_v49 = vmul.f32 %v788_v36, %v788_v36 }
  0xf0   : > { %v528_v39 = vadd.f32 %v527_v37, %v414_v38  ;;  %v566_v40 = vmul.f32 %v414_v38, %v414_v38  ;;  %v596_v41 = vadd.f32 %v595_v35, %v565_v34  ;;  %v789_v42 = vpop.f32.mrb[6].mxu0  ;;  %v478_v48 = vpop.f32.mrb[5].mxu1  ;;  %v578_v37 = vmul.f32 %v973_v28, %v973_v28 }
  0xf1   : > { %v417_v43 = vpop.f32.mrb[7].mxu0  ;;  %v981_v52 = vpop.f32.mrb[6].mxu1  ;;  %v569_v54 = vmul.f32 %v789_v42, %v789_v42 }
  0xf2   : > { %v597_v44 = vadd.f32 %v596_v41, %v566_v40  ;;  %v529_v45 = vadd.f32 %v528_v39, %v417_v43  ;;  %v567_v46 = vmul.f32 %v417_v43, %v417_v43  ;;  %v481_v53 = vpop.f32.mrb[7].mxu1  ;;  %v580_v43 = vmul.f32 %v971_v27, %v971_v27 }
  0xf4   : > { %v530_v50 = vadd.f32 %v788_v36, %v529_v45  ;;  %v598_v51 = vadd.f32 %v597_v44, %v567_v46  ;;  %v581_v46 = vmul.f32 %v975_v32, %v975_v32 }
  0xf6   : > { %v599_v55 = vadd.f32 %v598_v51, %v568_v49  ;;  %v792_v56 = vpop.f32.mrb[8].mxu0  ;;  %v531_v57 = vadd.f32 %v789_v42, %v530_v50  ;;  %v579_v42 = vmul.f32 %v977_v33, %v977_v33 }
  0xf7   : > { %v430_v58 = vpop.f32.mrb[9].mxu0  ;;  %v808_v3 = vpop.f32.mrb[8].mxu1  ;;  %v572_v5 = vmul.f32 %v792_v56, %v792_v56 }
  0xf8   : > { %v532_v59 = vadd.f32 %v531_v57, %v430_v58  ;;  %v570_v60 = vmul.f32 %v430_v58, %v430_v58  ;;  %v600_v61 = vadd.f32 %v599_v55, %v569_v54  ;;  %v793_v62 = vpop.f32.mrb[10].mxu0  ;;  %v494_v4 = vpop.f32.mrb[9].mxu1  ;;  %v583_v57 = vmul.f32 %v481_v53, %v481_v53 }
  0xf9   : > { %v433_v63 = vpop.f32.mrb[11].mxu0  ;;  %v809_v8 = vpop.f32.mrb[10].mxu1  ;;  %v573_v10 = vmul.f32 %v793_v62, %v793_v62 }
  0xfa   : > { %v601_v0 = vadd.f32 %v600_v61, %v570_v60  ;;  %v533_v1 = vadd.f32 %v532_v59, %v433_v63  ;;  %v571_v2 = vmul.f32 %v433_v63, %v433_v63  ;;  %v497_v9 = vpop.f32.mrb[11].mxu1 }
  0xfc   : > { %v534_v6 = vadd.f32 %v792_v56, %v533_v1  ;;  %v602_v7 = vadd.f32 %v601_v0, %v571_v2  ;;  %v587_v1 = vmul.f32 %v497_v9, %v497_v9  ;;  %v588_v2 = vmul.f32 %v808_v3, %v808_v3 }
  0xfe   : > { %v603_v11 = vadd.f32 %v602_v7, %v572_v5  ;;  %v796_v12 = vpop.f32.mrb[12].mxu0  ;;  %v535_v13 = vadd.f32 %v793_v62, %v534_v6  ;;  %v586_v62 = vmul.f32 %v494_v4, %v494_v4  ;;  %v589_v6 = vmul.f32 %v809_v8, %v809_v8 }
  0xff   : > { %v446_v14 = vpop.f32.mrb[13].mxu0  ;;  %v812_v23 = vpop.f32.mrb[12].mxu1  ;;  %v576_v25 = vmul.f32 %v796_v12, %v796_v12 }
 0x100   : > { %v536_v15 = vadd.f32 %v535_v13, %v446_v14  ;;  %v574_v16 = vmul.f32 %v446_v14, %v446_v14  ;;  %v604_v17 = vadd.f32 %v603_v11, %v573_v10  ;;  %v797_v18 = vpop.f32.mrb[14].mxu0  ;;  %v510_v24 = vpop.f32.mrb[13].mxu1 }
 0x101   : > { %v449_v19 = vpop.f32.mrb[15].mxu0  ;;  %v813_v30 = vpop.f32.mrb[14].mxu1  ;;  %v577_v34 = vmul.f32 %v797_v18, %v797_v18 }
 0x102   : > { %v605_v20 = vadd.f32 %v604_v17, %v574_v16  ;;  %v537_v21 = vadd.f32 %v536_v15, %v449_v19  ;;  %v575_v22 = vmul.f32 %v449_v19, %v449_v19  ;;  %v513_v31 = vpop.f32.mrb[15].mxu1  ;;  %v592_v16 = vmul.f32 %v812_v23, %v812_v23 }
 0x103   : > { %v591_v15 = vmul.f32 %v513_v31, %v513_v31  ;;  %v593_v17 = vmul.f32 %v813_v30, %v813_v30 }
 0x104   : > { %v538_v26 = vadd.f32 %v796_v12, %v537_v21  ;;  %v606_v29 = vadd.f32 %v605_v20, %v575_v22 }
 0x106   : > { %v607_v35 = vadd.f32 %v606_v29, %v576_v25  ;;  %v539_v36 = vadd.f32 %v797_v18, %v538_v26 }
 0x108   : > { %v540_v38 = vadd.f32 %v539_v36, %v973_v28  ;;  %v608_v39 = vadd.f32 %v607_v35, %v577_v34  ;;  %v582_v28 = vmul.f32 %v478_v48, %v478_v48 }
 0x10a   : > { %v609_v40 = vadd.f32 %v608_v39, %v578_v37  ;;  %v541_v41 = vadd.f32 %v540_v38, %v977_v33  ;;  %v584_v33 = vmul.f32 %v979_v47, %v979_v47 }
 0x10c   : > { %v542_v44 = vadd.f32 %v971_v27, %v541_v41  ;;  %v610_v45 = vadd.f32 %v609_v40, %v579_v42  ;;  %v585_v27 = vmul.f32 %v981_v52, %v981_v52 }
 0x10e   : > { %v611_v49 = vadd.f32 %v610_v45, %v580_v43  ;;  %v543_v50 = vadd.f32 %v975_v32, %v542_v44 }
 0x110   : > { %v544_v51 = vadd.f32 %v543_v50, %v478_v48  ;;  %v612_v54 = vadd.f32 %v611_v49, %v581_v46 }
 0x112   : > { %v613_v55 = vadd.f32 %v612_v54, %v582_v28  ;;  %v545_v56 = vadd.f32 %v544_v51, %v481_v53 }
 0x114   : > { %v546_v58 = vadd.f32 %v979_v47, %v545_v56  ;;  %v614_v59 = vadd.f32 %v613_v55, %v583_v57  ;;  %v590_v47 = vmul.f32 %v510_v24, %v510_v24 }
 0x116   : > { %v615_v60 = vadd.f32 %v614_v59, %v584_v33  ;;  %v547_v61 = vadd.f32 %v981_v52, %v546_v58 }
 0x118   : > { %v548_v32 = vadd.f32 %v547_v61, %v494_v4  ;;  %v616_v63 = vadd.f32 %v615_v60, %v585_v27 }
 0x11a   : > { %v617_v48 = vadd.f32 %v616_v63, %v586_v62  ;;  %v549_v0 = vadd.f32 %v548_v32, %v497_v9 }
 0x11c   : > { %v550_v53 = vadd.f32 %v808_v3, %v549_v0  ;;  %v618_v5 = vadd.f32 %v617_v48, %v587_v1 }
 0x11e   : > { %v619_v7 = vadd.f32 %v618_v5, %v588_v2  ;;  %v551_v10 = vadd.f32 %v809_v8, %v550_v53 }
 0x120   : > { %v552_v11 = vadd.f32 %v551_v10, %v510_v24  ;;  %v620_v12 = vadd.f32 %v619_v7, %v589_v6 }
 0x122   : > { %v621_v13 = vadd.f32 %v620_v12, %v590_v47  ;;  %v553_v14 = vadd.f32 %v552_v11, %v513_v31 }
 0x124   : > { %v554_v52 = vadd.f32 %v812_v23, %v553_v14  ;;  %v622_v4 = vadd.f32 %v621_v13, %v591_v15 }
 0x126   : > { %v555_v18 = vadd.f32 %v813_v30, %v554_v52  ;;  %v623_v19 = vadd.f32 %v622_v4, %v592_v16 }
 0x128   : > { %v556_v9 = vrot.slane %v555_v18, 4  ;;  %v624_v20 = vadd.f32 %v623_v19, %v593_v17 }
 0x12a   : > { %v557_v3 = vadd.f32 %v556_v9, %v555_v18  ;;  %v625_v21 = vrot.slane %v624_v20, 4 }
 0x12c   : > { %v558_v22 = vrot.slane %v557_v3, 2  ;;  %v626_v25 = vadd.f32 %v625_v21, %v624_v20 }
 0x12e   : > { %v559_v8 = vadd.f32 %v558_v22, %v557_v3  ;;  %v627_v26 = vrot.slane %v626_v25, 2 }
 0x130   : > { %v560_v24 = vrot.slane %v559_v8, 1  ;;  %v628_v29 = vadd.f32 %v627_v26, %v626_v25 }
 0x132   : > { %v629_v34 = vrot.slane %v628_v29, 1  ;;  %v561_v23 = vadd.f32 %v560_v24, %v559_v8 }
 0x134   : > { %v630_v30 = vadd.f32 %v629_v34, %v628_v29 }
 0x136   : > { %v632_v31 = vsel %vm631_vm2, %v561_v23, %v630_v30 }
 0x137   : > { %633 = vst [vmem:[%s177_s26] sm:$0x3] %v632_v31 }
 0x138 PF: > { %s12_s11 = sadd.s32 1, %s887_s11   ;;  %s1017_s9 = smov %s883_s10 }
 0x139   : > { %p9_p5 = scmp.ge.s32.totalorder %s12_s11, 4   ;;  %s1018_s10 = smov %s1020_s12 }
 0x13b   :  { %11 = sbr.rel (!%p9_p5) target bundleno = 2 (0x2), region = 58 }

// kernel: cnn_block_forward.3
= control target key start
LH: loop header
LB: loop body
LE: loop exit
PB: predicated region body
PF: predicated region fallthrough
CT: control target
= control target key end

     0   :  { %s1054_s15 = smov 0   ;;  %s1056_s16 = smov 0   ;;  %s1214_s0 = inlined_call_operand.vmem [shape: bf16[2,256,36], index: 0, kind: input, shape index: {}]   ;;  %s1215_s1 = inlined_call_operand.vmem [shape: bf16[36,128], index: 1, kind: input, shape index: {}]   ;;  %s1216_s2 = inlined_call_operand.vmem [shape: f32[1,128], index: 2, kind: input, shape index: {}]   ;;  %s1217_s3 = inlined_call_operand.vmem [shape: f32[1,128], index: 3, kind: input, shape index: {}]   ;;  %s1218_s4 = inlined_call_operand.vmem [shape: f32[2,8,256], index: 4, kind: output, shape index: {}]  }
   0x1   :  { %s1058_s17 = smov 0  }
   0x2 LB: > { %s26_s18 = sadd.s32 1, %s1023_s16  ;;  %p851_p0 = scmp.ge.s32.totalorder %s1027_s17, 1  ;;  %s1027_s17 = sphi %s1058_s17, %s14_s17   ;;  %s1023_s16 = sphi %s1056_s16, %s1220_s16   ;;  %s1019_s15 = sphi %s1054_s15, %s1219_s15  }
   0x3   : > { %p28_p1 = scmp.ge.s32.totalorder %s26_s18, 2  ;;  %p183_p2 = scmp.lt.s32.totalorder %s1027_s17, 3 }
   0x5   : > { %s1222_s18 = smov (%p28_p1, %s26_s18), 0  ;;  %p184_p3 = pnand %p851_p0, %p183_p2 }
   0x6   : > { %v986_v0 = vld [vmem:[%s1215_s1] sm:$0xff] (!%p184_p3)   ;;  %v987_v1 = vld [vmem:[%s1215_s1 + $0x8] sm:$0xff] (!%p184_p3)   ;;  %p218_p4 = scmp.lt.s32.totalorder (!%p184_p3), %s1019_s15, 1  ;;  %v988_v2 = vld [vmem:[%s1215_s1 + $0x10] ss:$0 sps:$4 sm:$0x33] (!%p184_p3)  }
   0x7   : > { %187 = sbr.rel (%p184_p3) target bundleno = 369 (0x171), region = 36  ;;  %916 = vmatprep.subr.bf16.mxu0 (!%p184_p3), %v986_v0  ;;  %954 = vmatprep.subr.bf16.mxu1 (!%p184_p3), %v986_v0  ;;  %vm419_vm0 = vcmask (!%p184_p3), 1041408   ;;  %vm370_vm1 = vcmask (!%p184_p3), 293888   ;;  %v1124_v20 = vld [vmem:[%s1216_s2] ss:$0 sm:$0xff] (!%p184_p3) }
   0x8   : > { %917 = vmatpush3.bf16.msra.mxu0 (!%p184_p3), %v986_v0  ;;  %957 = vmatpush3.bf16.msra.mxu1 (!%p184_p3), %v986_v0  ;;  %v421_v4 = vsel (!%p184_p3), %vm419_vm0, %v988_v2, 0  ;;  %v1129_v25 = vld [vmem:[%s1217_s3] ss:$0 sm:$0xff] (!%p184_p3) }
   0x9   : > { %918 = vmatprep.subr.bf16.mxu0 (!%p184_p3), %v987_v1  ;;  %955 = vmatprep.subr.bf16.mxu1 (!%p184_p3), %v987_v1 }
   0xc   : > { %919 = vmatpush3.bf16.msra.mxu0 (!%p184_p3), %v987_v1  ;;  %958 = vmatpush3.bf16.msra.mxu1 (!%p184_p3), %v987_v1 }
   0xd   : > { %960 = vmatprep.subr.msk.bf16.mxu0 (!%p184_p3), %vm419_vm0, %v988_v2  ;;  %961 = vmatprep.subr.msk.bf16.mxu1 (!%p184_p3), %vm419_vm0, %v988_v2 }
   0xe   : > { %s1224_s15 = smov (!%p218_p4, %s1019_s15), 1 }
   0xf   : > { %s895_s25 = sshll.u32 %s1224_s15, 7  ;;  %s896_s7 = sshll.u32 %s1224_s15, 4 }
  0x10   : > { %s1087_s28 = scalar_lea.vmem %s1214_s0, %s895_s25  ;;  %921 = vmatpush3.bf16.msra.mxu0 %v421_v4  ;;  %959 = vmatpush3.bf16.msra.mxu1 %v421_v4  ;;  %s235_s10 = scalar_lea.vmem %s1218_s4, %s896_s7 }
  0x11   : > { %v989_v3 = vld [vmem:[%s1087_s28] sm:$0xff]   ;;  %v991_v6 = vld [vmem:[%s1087_s28 + $0x8] sm:$0xff]   ;;  %v993_v8 = vld [vmem:[%s1087_s28 + $0x10] sm:$0xff]  }
  0x12   : > { %v990_v5 = vld [vmem:[%s1087_s28 + $0x40] sm:$0xff]   ;;  %922 = vmatprep.mubr.msk.bf16.mxu0 %vm370_vm1, %v989_v3  ;;  %v992_v7 = vld [vmem:[%s1087_s28 + $0x48] sm:$0xff]   ;;  %v994_v9 = vld [vmem:[%s1087_s28 + $0x50] sm:$0xff]  }
  0x13   : > { %938 = vmatprep.mubr.msk.bf16.mxu1 %vm370_vm1, %v990_v5  ;;  %923 = vmatmul.mubr.msk.bf16.vlgmr.msra.gmra.mrb[0].mxu0 %vm370_vm1, %v991_v6  ;;  %v995_v10 = vld [vmem:[%s1087_s28 + $0x18] sm:$0xff]   ;;  %v997_v12 = vld [vmem:[%s1087_s28 + $0x20] sm:$0xff]   ;;  %v999_v14 = vld [vmem:[%s1087_s28 + $0x28] sm:$0xff]  }
  0x14   : > { %939 = vmatmul.mubr.msk.bf16.vlgmr.msra.gmra.mrb[0].mxu1 %vm370_vm1, %v992_v7  ;;  %926 = vmatprep.mubr.msk.bf16.mxu0 %vm370_vm1, %v993_v8  ;;  %v996_v11 = vld [vmem:[%s1087_s28 + $0x58] sm:$0xff]   ;;  %v998_v13 = vld [vmem:[%s1087_s28 + $0x60] sm:$0xff]   ;;  %v1000_v15 = vld [vmem:[%s1087_s28 + $0x68] sm:$0xff]  }
  0x15   : > { %942 = vmatprep.mubr.msk.bf16.mxu1 %vm370_vm1, %v994_v9  ;;  %v1001_v16 = vld [vmem:[%s1087_s28 + $0x30] sm:$0xff]   ;;  %v1003_v18 = vld [vmem:[%s1087_s28 + $0x38] sm:$0xff]  }
  0x16   : > { %v1002_v17 = vld [vmem:[%s1087_s28 + $0x70] sm:$0xff]   ;;  %v1004_v19 = vld [vmem:[%s1087_s28 + $0x78] sm:$0xff]  }
  0x1b   : > { %927 = vmatmul.mubr.msk.bf16.gmra.mrb[4].mxu0 %vm370_vm1, %v995_v10 }
  0x1c   : > { %943 = vmatmul.mubr.msk.bf16.gmra.mrb[4].mxu1 %vm370_vm1, %v996_v11  ;;  %930 = vmatprep.mubr.msk.bf16.mxu0 %vm370_vm1, %v997_v12 }
  0x1d   : > { %946 = vmatprep.mubr.msk.bf16.mxu1 %vm370_vm1, %v998_v13 }
  0x23   : > { %931 = vmatmul.mubr.msk.bf16.gmra.mrb[8].mxu0 %vm370_vm1, %v999_v14 }
  0x24   : > { %947 = vmatmul.mubr.msk.bf16.gmra.mrb[8].mxu1 %vm370_vm1, %v1000_v15  ;;  %934 = vmatprep.mubr.msk.bf16.mxu0 %vm370_vm1, %v1001_v16 }
  0x25   : > { %950 = vmatprep.mubr.msk.bf16.mxu1 %vm370_vm1, %v1002_v17 }
  0x2b   : > { %935 = vmatmul.mubr.msk.bf16.gmra.mrb[12].mxu0 %vm370_vm1, %v1003_v18 }
  0x2c   : > { %951 = vmatmul.mubr.msk.bf16.gmra.mrb[12].mxu1 %vm370_vm1, %v1004_v19 }
  0xe6   : > { %v924_v21 = vpop.f32.mrb[0].mxu0 }
  0xe7   : > { %v940_v22 = vpop.f32.mrb[0].mxu1  ;;  %v457_v23 = vpop.f32.mrb[1].mxu0  ;;  %v593_v36 = vmul.f32 %v924_v21, %v1124_v20 }
  0xe8   : > { %v521_v24 = vpop.f32.mrb[1].mxu1  ;;  %v591_v26 = vmul.f32 %v1124_v20, %v457_v23  ;;  %v925_v28 = vpop.f32.mrb[2].mxu0  ;;  %v609_v37 = vmul.f32 %v940_v22, %v1124_v20 }
  0xe9   : > { %v607_v27 = vmul.f32 %v1124_v20, %v521_v24  ;;  %v941_v29 = vpop.f32.mrb[2].mxu1  ;;  %v460_v30 = vpop.f32.mrb[3].mxu0  ;;  %v594_v44 = vmul.f32 %v925_v28, %v1124_v20  ;;  %v632_v53 = vadd.f32 %v1129_v25, %v593_v36 }
  0xea   : > { %v524_v31 = vpop.f32.mrb[3].mxu1  ;;  %v592_v32 = vmul.f32 %v1124_v20, %v460_v30  ;;  %v630_v35 = vadd.f32 %v1129_v25, %v591_v26  ;;  %v610_v45 = vmul.f32 %v941_v29, %v1124_v20  ;;  %v648_v52 = vadd.f32 %v1129_v25, %v609_v37 }
  0xeb   : > { %v608_v33 = vmul.f32 %v1124_v20, %v524_v31  ;;  %v646_v34 = vadd.f32 %v1129_v25, %v607_v27  ;;  %v664_v59 = vmax.f32 %v632_v53, 0.0  ;;  %v633_v61 = vadd.f32 %v1129_v25, %v594_v44 }
  0xec   : > { %v662_v39 = vmax.f32 %v630_v35, 0.0  ;;  %v631_v41 = vadd.f32 %v1129_v25, %v592_v32  ;;  %v680_v58 = vmax.f32 %v648_v52, 0.0  ;;  %v649_v60 = vadd.f32 %v1129_v25, %v610_v45 }
  0xed   : > { %v678_v38 = vmax.f32 %v646_v34, 0.0  ;;  %v647_v40 = vadd.f32 %v1129_v25, %v608_v33  ;;  %v665_v7 = vmax.f32 %v633_v61, 0.0 }
  0xee   : > { %694 = vxpose.xlu0.b32.start [1/16] (narrow) %v662_v39, 8  ;;  %v928_v42 = vpop.f32.mrb[4].mxu0  ;;  %v663_v49 = vmax.f32 %v631_v41, 0.0  ;;  %v681_v6 = vmax.f32 %v649_v60, 0.0 }
  0xef   : > { %726 = vxpose.xlu1.b32.start [1/16] (narrow) %v678_v38, 8  ;;  %v944_v43 = vpop.f32.mrb[4].mxu1  ;;  %v473_v46 = vpop.f32.mrb[5].mxu0  ;;  %v679_v48 = vmax.f32 %v647_v40, 0.0  ;;  %v597_v14 = vmul.f32 %v928_v42, %v1124_v20 }
  0xf0   : > { %v537_v47 = vpop.f32.mrb[5].mxu1  ;;  %v929_v50 = vpop.f32.mrb[6].mxu0  ;;  %v595_v56 = vmul.f32 %v1124_v20, %v473_v46  ;;  %v613_v15 = vmul.f32 %v944_v43, %v1124_v20 }
  0xf1   : > { %v945_v51 = vpop.f32.mrb[6].mxu1  ;;  %v476_v55 = vpop.f32.mrb[7].mxu0  ;;  %v611_v57 = vmul.f32 %v1124_v20, %v537_v47  ;;  %v598_v21 = vmul.f32 %v929_v50, %v1124_v20  ;;  %v636_v29 = vadd.f32 %v1129_v25, %v597_v14 }
  0xf2   : > { %v540_v54 = vpop.f32.mrb[7].mxu1  ;;  %695 = vxpose.xlu0.b32.cont [2/16] (narrow) %v663_v49, 8  ;;  %v634_v63 = vadd.f32 %v1129_v25, %v595_v56  ;;  %v596_v5 = vmul.f32 %v1124_v20, %v476_v55  ;;  %v614_v22 = vmul.f32 %v945_v51, %v1124_v20  ;;  %v652_v28 = vadd.f32 %v1129_v25, %v613_v15 }
  0xf3   : > { %727 = vxpose.xlu1.b32.cont [2/16] (narrow) %v679_v48, 8  ;;  %v650_v62 = vadd.f32 %v1129_v25, %v611_v57  ;;  %v612_v4 = vmul.f32 %v1124_v20, %v540_v54  ;;  %v668_v37 = vmax.f32 %v636_v29, 0.0  ;;  %v637_v39 = vadd.f32 %v1129_v25, %v598_v21 }
  0xf4   : > { %v666_v13 = vmax.f32 %v634_v63, 0.0  ;;  %v635_v17 = vadd.f32 %v1129_v25, %v596_v5  ;;  %v684_v36 = vmax.f32 %v652_v28, 0.0  ;;  %v653_v38 = vadd.f32 %v1129_v25, %v614_v22 }
  0xf5   : > { %v682_v12 = vmax.f32 %v650_v62, 0.0  ;;  %v651_v16 = vadd.f32 %v1129_v25, %v612_v4  ;;  %v669_v45 = vmax.f32 %v637_v39, 0.0 }
  0xf6   : > { %696 = vxpose.xlu0.b32.cont [3/16] (narrow) %v664_v59, 8  ;;  %v932_v0 = vpop.f32.mrb[8].mxu0  ;;  %v667_v27 = vmax.f32 %v635_v17, 0.0  ;;  %v685_v44 = vmax.f32 %v653_v38, 0.0 }
  0xf7   : > { %728 = vxpose.xlu1.b32.cont [3/16] (narrow) %v680_v58, 8  ;;  %v948_v1 = vpop.f32.mrb[8].mxu1  ;;  %v489_v2 = vpop.f32.mrb[9].mxu0  ;;  %v683_v26 = vmax.f32 %v651_v16, 0.0  ;;  %v601_v48 = vmul.f32 %v932_v0, %v1124_v20 }
  0xf8   : > { %v553_v3 = vpop.f32.mrb[9].mxu1  ;;  %v933_v8 = vpop.f32.mrb[10].mxu0  ;;  %v599_v34 = vmul.f32 %v1124_v20, %v489_v2  ;;  %v617_v49 = vmul.f32 %v948_v1, %v1124_v20 }
  0xf9   : > { %v949_v9 = vpop.f32.mrb[10].mxu1  ;;  %v492_v11 = vpop.f32.mrb[11].mxu0  ;;  %v615_v35 = vmul.f32 %v1124_v20, %v553_v3  ;;  %v602_v52 = vmul.f32 %v933_v8, %v1124_v20  ;;  %v640_v57 = vadd.f32 %v1129_v25, %v601_v48 }
  0xfa   : > { %v556_v10 = vpop.f32.mrb[11].mxu1  ;;  %697 = vxpose.xlu0.b32.cont [4/16] (narrow) %v665_v7, 8  ;;  %v638_v41 = vadd.f32 %v1129_v25, %v599_v34  ;;  %v600_v43 = vmul.f32 %v1124_v20, %v492_v11  ;;  %v618_v53 = vmul.f32 %v949_v9, %v1124_v20  ;;  %v656_v56 = vadd.f32 %v1129_v25, %v617_v49 }
  0xfb   : > { %729 = vxpose.xlu1.b32.cont [4/16] (narrow) %v681_v6, 8  ;;  %v654_v40 = vadd.f32 %v1129_v25, %v615_v35  ;;  %v616_v42 = vmul.f32 %v1124_v20, %v556_v10  ;;  %v672_v61 = vmax.f32 %v640_v57, 0.0  ;;  %v641_v63 = vadd.f32 %v1129_v25, %v602_v52 }
  0xfc   : > { %v670_v47 = vmax.f32 %v638_v41, 0.0  ;;  %v639_v51 = vadd.f32 %v1129_v25, %v600_v43  ;;  %v688_v60 = vmax.f32 %v656_v56, 0.0  ;;  %v657_v62 = vadd.f32 %v1129_v25, %v618_v53 }
  0xfd   : > { %v686_v46 = vmax.f32 %v654_v40, 0.0  ;;  %v655_v50 = vadd.f32 %v1129_v25, %v616_v42  ;;  %v673_v5 = vmax.f32 %v641_v63, 0.0 }
  0xfe   : > { %698 = vxpose.xlu0.b32.cont [5/16] (narrow) %v666_v13, 8  ;;  %v1157_v18 = vpop.f32.mrb[12].mxu0  ;;  %v671_v55 = vmax.f32 %v639_v51, 0.0  ;;  %v689_v4 = vmax.f32 %v657_v62, 0.0 }
  0xff   : > { %730 = vxpose.xlu1.b32.cont [5/16] (narrow) %v682_v12, 8  ;;  %v1159_v19 = vpop.f32.mrb[12].mxu1  ;;  %v505_v23 = vpop.f32.mrb[13].mxu0  ;;  %v687_v54 = vmax.f32 %v655_v50, 0.0  ;;  %v605_v8 = vmul.f32 %v1157_v18, %v1124_v20 }
 0x100   : > { %v569_v24 = vpop.f32.mrb[13].mxu1  ;;  %v937_v30 = vpop.f32.mrb[14].mxu0  ;;  %v603_v58 = vmul.f32 %v1124_v20, %v505_v23  ;;  %v621_v9 = vmul.f32 %v1159_v19, %v1124_v20 }
 0x101   : > { %v953_v31 = vpop.f32.mrb[14].mxu1  ;;  %v508_v33 = vpop.f32.mrb[15].mxu0  ;;  %v619_v59 = vmul.f32 %v1124_v20, %v569_v24  ;;  %v606_v12 = vmul.f32 %v937_v30, %v1124_v20  ;;  %v644_v17 = vadd.f32 %v1129_v25, %v605_v8 }
 0x102   : > { %v572_v32 = vpop.f32.mrb[15].mxu1  ;;  %699 = vxpose.xlu0.b32.cont [6/16] (narrow) %v667_v27, 8  ;;  %v642_v1 = vadd.f32 %v1129_v25, %v603_v58  ;;  %v604_v3 = vmul.f32 %v1124_v20, %v508_v33  ;;  %v622_v13 = vmul.f32 %v953_v31, %v1124_v20  ;;  %v660_v16 = vadd.f32 %v1129_v25, %v621_v9 }
 0x103   : > { %731 = vxpose.xlu1.b32.cont [6/16] (narrow) %v683_v26, 8  ;;  %v658_v0 = vadd.f32 %v1129_v25, %v619_v59  ;;  %v620_v2 = vmul.f32 %v1124_v20, %v572_v32  ;;  %v676_v19 = vmax.f32 %v644_v17, 0.0  ;;  %v645_v22 = vadd.f32 %v1129_v25, %v606_v12 }
 0x104   : > { %v674_v7 = vmax.f32 %v642_v1, 0.0  ;;  %v643_v11 = vadd.f32 %v1129_v25, %v604_v3  ;;  %v692_v18 = vmax.f32 %v660_v16, 0.0  ;;  %v661_v21 = vadd.f32 %v1129_v25, %v622_v13 }
 0x105   : > { %v690_v6 = vmax.f32 %v658_v0, 0.0  ;;  %v659_v10 = vadd.f32 %v1129_v25, %v620_v2  ;;  %v677_v24 = vmax.f32 %v645_v22, 0.0 }
 0x106   : > { %700 = vxpose.xlu0.b32.cont [7/16] (narrow) %v668_v37, 8  ;;  %v675_v15 = vmax.f32 %v643_v11, 0.0  ;;  %v693_v23 = vmax.f32 %v661_v21, 0.0 }
 0x107   : > { %732 = vxpose.xlu1.b32.cont [7/16] (narrow) %v684_v36, 8  ;;  %v691_v14 = vmax.f32 %v659_v10, 0.0 }
 0x10a   : > { %701 = vxpose.xlu0.b32.cont [8/16] (narrow) %v669_v45, 8 }
 0x10b   : > { %733 = vxpose.xlu1.b32.cont [8/16] (narrow) %v685_v44, 8 }
 0x10e   : > { %702 = vxpose.xlu0.b32.cont [9/16] (narrow) %v670_v47, 8 }
 0x10f   : > { %734 = vxpose.xlu1.b32.cont [9/16] (narrow) %v686_v46, 8 }
 0x112   : > { %703 = vxpose.xlu0.b32.cont [10/16] (narrow) %v671_v55, 8 }
 0x113   : > { %735 = vxpose.xlu1.b32.cont [10/16] (narrow) %v687_v54, 8 }
 0x116   : > { %704 = vxpose.xlu0.b32.cont [11/16] (narrow) %v672_v61, 8 }
 0x117   : > { %736 = vxpose.xlu1.b32.cont [11/16] (narrow) %v688_v60, 8 }
 0x11a   : > { %705 = vxpose.xlu0.b32.cont [12/16] (narrow) %v673_v5, 8 }
 0x11b   : > { %737 = vxpose.xlu1.b32.cont [12/16] (narrow) %v689_v4, 8 }
 0x11e   : > { %706 = vxpose.xlu0.b32.cont [13/16] (narrow) %v674_v7, 8 }
 0x11f   : > { %738 = vxpose.xlu1.b32.cont [13/16] (narrow) %v690_v6, 8 }
 0x122   : > { %707 = vxpose.xlu0.b32.cont [14/16] (narrow) %v675_v15, 8 }
 0x123   : > { %739 = vxpose.xlu1.b32.cont [14/16] (narrow) %v691_v14, 8 }
 0x126   : > { %708 = vxpose.xlu0.b32.cont [15/16] (narrow) %v676_v19, 8 }
 0x127   : > { %740 = vxpose.xlu1.b32.cont [15/16] (narrow) %v692_v18, 8 }
 0x12a   : > { %709 = vxpose.xlu0.b32.end [16/16] (narrow) %v677_v24, 8 }
 0x12b   : > { %741 = vxpose.xlu1.b32.end [16/16] (narrow) %v693_v23, 8 }
 0x16e   : > { %v710_v26 = vpop.trf.xlu0 }
 0x16f   : > { %v742_v20 = vpop.trf.xlu1  ;;  %758 = vst [vmem:[%s235_s10] sm:$0xff] %v710_v26 }
 0x170   : > { %759 = vst [vmem:[%s235_s10 + $0x8] sm:$0xff] %v742_v20 }
 0x171 PF: > { %s14_s17 = sadd.s32 1, %s1027_s17   ;;  %s1219_s15 = smov %s1023_s16 }
 0x172   : > { %p11_p5 = scmp.ge.s32.totalorder %s14_s17, 4   ;;  %s1220_s16 = smov %s1222_s18 }
 0x174   :  { %13 = sbr.rel (!%p11_p5) target bundleno = 2 (0x2), region = 66 }

</bundles_post_ra>
